<compile_context>
chip_gen: v7x
topology: tpu7x:2x2x1
jax: 0.10.0
libtpu: 0.0.40
codegen_flags: <defaults>
</compile_context>

<pallas_src>
import math
import functools

import jax
import jax.numpy as jnp
from jax import lax
from jax.experimental import pallas as pl
from jax.experimental.pallas import tpu as pltpu

# ------------------------- config (mirrors torch `args`) -------------------------
BATCH = 2
NHEADS = 2
HEAD_DIM = 32            # H
MEM_SZ = 16              # M (number of query positions in the block)
ATTN_LIM = 32            # L (maximum span / AdaptiveMask.size)
ADAPT_SPAN = True
ADAPT_SPAN_LAYER = False
FEEDBACK = False
ADAPT_SPAN_LEN = 8       # ramp_size
ADAPT_SPAN_TRIM_STEP = 8
DROPOUT = 0.0            # dropout p=0 / eval mode -> identity
HEADS_PER_BLOCK = 2      # 2 heads per grid step: both v7x TCs busy, near-minimal
                         # per-step overhead on single-TC v5e/v6e.


# --------------------------- in-kernel helper: band skew --------------------------
def _shift_right_lanes(x, amount):
    """Shift a (rows, W) tile right along lanes by `amount`, filling zeros."""
    if amount == 0:
        return x
    rows, w = x.shape
    pad = jnp.zeros((rows, amount), x.dtype)
    return jnp.concatenate([pad, x[:, : w - amount]], axis=1)


def _skew_rows(p, out_width):
    """out[m, k] = p[m, k - m] for 0 <= k - m < L_eff, else 0.

    Row m is shifted right by m using a binary (log2 M) decomposition of the
    shift amount: 4 lane-shifts + per-row selects instead of an L_eff-long
    where-scatter.  Requires out_width - L_eff >= M (true here: MK = L_eff + M).
    """
    m_rows, l_eff = p.shape
    cur = jnp.concatenate(
        [p, jnp.zeros((m_rows, out_width - l_eff), p.dtype)], axis=1)
    row = lax.broadcasted_iota(jnp.int32, (m_rows, 1), 0)
    nbits = max(1, (m_rows - 1).bit_length())
    for b in range(nbits):
        sh = 1 << b
        shifted = _shift_right_lanes(cur, sh)
        cur = jnp.where((row & sh) != 0, shifted, cur)
    return cur


# ------------------------------- Pallas kernel -----------------------------------
def _seq_attn_kernel(ratio_ref, q_ref, kx_ref, v_ref, o_ref,
                     *, M, MK, L_eff, H, HPB):
    inv_sqrt_h = 1.0 / math.sqrt(H)
    inv_ramp = 1.0 / ADAPT_SPAN_LEN

    # absolute-coordinate band geometry, shared by every head in this block
    m_idx = lax.broadcasted_iota(jnp.int32, (M, MK), 0)
    k_idx = lax.broadcasted_iota(jnp.int32, (M, MK), 1)
    diff = k_idx - m_idx                                   # relative offset l = k - m
    valid = (diff >= 0) & (diff < L_eff)                   # the attended band
    diff_f = diff.astype(jnp.float32)

    outs = []
    for h in range(HPB):                                   # static unroll (HPB = 2)
        q = q_ref[h]                                       # (M, H)
        kx = kx_ref[h]                                     # (MK + L_eff, H) = [key ; pe^T]
        v = v_ref[h]                                       # (MK, H)

        # single fused MXU push: content scores and relative-PE scores together
        scores = lax.dot_general(q, kx, (((1,), (1,)), ((), ())),
                                 preferred_element_type=jnp.float32)  # (M, MK+L_eff)
        s = scores[:, :MK]                                 # q @ key^T      (M, MK)
        p = scores[:, MK:]                                 # q @ key_pe     (M, L_eff)

        # "skew": place the relative-PE scores onto the absolute-coordinate band
        p_skew = _skew_rows(p, MK)                         # (M, MK)

        logits = (s + p_skew) * inv_sqrt_h
        logits = jnp.where(valid, logits, -1e30)
        logits = logits - jnp.max(logits, axis=-1, keepdims=True)
        e = jnp.where(valid, jnp.exp(logits), 0.0)

        # adaptive-span mask computed in-kernel from the per-head size_ratio
        ratio = ratio_ref[pl.program_id(0) * HPB + h]      # f32 scalar from SMEM
        offs = ratio * (ATTN_LIM * inv_ramp) - (L_eff - 1) * inv_ramp + 1.0
        span = jnp.clip(diff_f * inv_ramp + offs, 0.0, 1.0)

        # fold the mask into the softmax normalisation (single row reduction,
        # reciprocal on the EUP); softmax + mask + renorm of the reference.
        w = e * span
        inv_norm = pl.reciprocal(jnp.sum(w, axis=-1, keepdims=True) + 1e-8,
                                 approx=True)
        attn = w * inv_norm
        # dropout with p=0 (eval) -> identity

        outs.append(jnp.dot(attn, v, preferred_element_type=jnp.float32))  # (M, H)

    # one lane-dense store: (M, HPB*H) slab instead of HPB masked 32-lane writes
    o_ref[0] = jnp.concatenate(outs, axis=-1).astype(o_ref.dtype)


def seq_attention_pallas(query, k_ext, value, ratio_rows,
                         *, heads_per_block=HEADS_PER_BLOCK):
    B, M, H = query.shape
    MKX = k_ext.shape[1]
    MK = value.shape[1]
    L_eff = MKX - MK

    hpb = min(heads_per_block, B)
    while B % hpb:
        hpb -= 1
    G = B // hpb

    kernel = functools.partial(_seq_attn_kernel,
                               M=M, MK=MK, L_eff=L_eff, H=H, HPB=hpb)

    out = pl.pallas_call(
        kernel,
        out_shape=jax.ShapeDtypeStruct((G, M, hpb * H), jnp.float32),
        grid_spec=pltpu.PrefetchScalarGridSpec(
            num_scalar_prefetch=0,
            grid=(G,),
            in_specs=[
                # per-(batch*head) size_ratio scalars, read directly from SMEM
                pl.BlockSpec(memory_space=pltpu.MemorySpace.SMEM),
                pl.BlockSpec((hpb, M, H), lambda g: (g, 0, 0)),     # query
                pl.BlockSpec((hpb, MKX, H), lambda g: (g, 0, 0)),   # [key ; key_pe^T]
                pl.BlockSpec((hpb, MK, H), lambda g: (g, 0, 0)),    # value
            ],
            out_specs=pl.BlockSpec((1, M, hpb * H), lambda g: (g, 0, 0)),
        ),
        compiler_params=pltpu.CompilerParams(dimension_semantics=("parallel",)),
    )(ratio_rows, query, k_ext, value)

    # (G, M, hpb*H) lane-dense slab -> (B, M, H)
    out = out.reshape(G, M, hpb, H).transpose(0, 2, 1, 3).reshape(B, M, H)
    return out


# ----------------------------- glue (parameter prep) ------------------------------
def compute_trim_len(max_size_ratio):
    """AdaptiveSpan.get_trim_len — host-side static (no device->host sync)."""
    L = ATTN_LIM
    max_size = max_size_ratio * L + ADAPT_SPAN_LEN
    max_size = max(0, min(L, math.ceil(max_size)))
    trim_len = min(L - 1, L - max_size)
    trim_len = (trim_len // ADAPT_SPAN_TRIM_STEP) * ADAPT_SPAN_TRIM_STEP
    return trim_len


def trim_memory(key, value, key_pe, trim_len):
    """AdaptiveSpan.trim_memory (static slicing)."""
    L = ATTN_LIM
    cache_size = key.shape[1] - MEM_SZ
    trim_len_cache = trim_len - (L - cache_size)
    # TODO(synk): the F.pad "cache too short" warning branch is not implemented.
    assert trim_len_cache >= 0
    if trim_len_cache > 0:
        key = key[:, trim_len_cache:, :]
        value = value[:, trim_len_cache:, :]
    if trim_len > 0:
        key_pe = key_pe[:, :, trim_len:]
    return key, value, key_pe


@functools.partial(jax.jit, static_argnames=("trim_len",))
def seq_attention_forward(query, key, value, key_pe, size_ratio, *, trim_len):
    """SeqAttention.forward (adapt_span=True, adapt_span_layer=False, feedback=False)."""
    B, M, H = query.shape
    key, value, key_pe = trim_memory(key, value, key_pe, trim_len)
    MK = key.shape[1]
    L_eff = key_pe.shape[2]
    assert MK == L_eff + M

    # fused "extended key" so the kernel does a single MXU push per head
    pe_rows = jnp.broadcast_to(jnp.swapaxes(key_pe, 1, 2), (B, L_eff, H))
    k_ext = jnp.concatenate([key, pe_rows], axis=1)        # (B, MK + L_eff, H)

    # per (batch*head) row size_ratio (batch-major, head-minor ordering)
    ratio_rows = jnp.tile(size_ratio, B // NHEADS)         # (B,)

    out = seq_attention_pallas(query, k_ext, value, ratio_rows)
    aux_loss = 0.0
    return out, aux_loss


# ----------------------------- pure-JAX reference --------------------------------
def _unskew(X):
    B, M, LM = X.shape
    L = LM - M
    X = X.reshape(B, M * LM)
    X = jnp.pad(X, ((0, 0), (0, M)))
    X = X.reshape(B, M, LM + 1)
    return X[:, :, :L]


def _skew(X, pad_value):
    B, M, L = X.shape
    X = jnp.pad(X, ((0, 0), (0, 0), (0, M + 1)), constant_values=pad_value)
    X = X.reshape(B, M * (L + M + 1))
    X = X[:, :-M]
    return X.reshape(B, M, L + M)


def adaptive_mask_relative(size_ratio, L_eff):
    """AdaptiveMask mask in relative coordinates, narrowed to L_eff."""
    L = ATTN_LIM
    template = jnp.arange(1 - L, 1, dtype=jnp.float32)     # linspace(1-L, 0, L)
    mask = template[None, :] + size_ratio[:, None] * L
    mask = mask / ADAPT_SPAN_LEN + 1.0
    mask = jnp.clip(mask, 0.0, 1.0)
    if L_eff < L:
        mask = mask[:, L - L_eff:]
    return mask                                            # (nheads, L_eff)


def seq_attention_reference(query, key, value, key_pe, size_ratio, trim_len):
    hp = lax.Precision.HIGHEST
    key, value, key_pe = trim_memory(key, value, key_pe, trim_len)
    attn = jnp.matmul(query, jnp.swapaxes(key, -1, -2), precision=hp)
    attn = _unskew(attn)
    attn = attn + jnp.matmul(query, key_pe, precision=hp)
    attn = attn / math.sqrt(HEAD_DIM)
    attn = jax.nn.softmax(attn, axis=-1)
    B, M, Lf = attn.shape
    attn = attn.reshape(B // NHEADS, NHEADS, M, Lf)
    rel_mask = adaptive_mask_relative(size_ratio, Lf)
    attn = attn * rel_mask[None, :, None, :]
    attn = attn.reshape(B, M, Lf)
    attn = attn / (attn.sum(-1, keepdims=True) + 1e-8)
    attn_cont = _skew(attn, 0.0)
    return jnp.matmul(attn_cont, value, precision=hp)


# ------------------------------------- main ---------------------------------------
if __name__ == "__main__":
    root = jax.random.PRNGKey(0)
    k1, k2, k3, k4 = jax.random.split(root, 4)

    B = BATCH * NHEADS
    M, H, L = MEM_SZ, HEAD_DIM, ATTN_LIM

    query = jax.random.normal(k1, (B, M, H), dtype=jnp.float32)
    key_in = jax.random.normal(k2, (B, L + M, H), dtype=jnp.float32)
    value_in = jax.random.normal(k3, (B, L + M, H), dtype=jnp.float32)
    key_pe = 0.1 * jax.random.normal(k4, (1, H, L), dtype=jnp.float32)   # pos_emb param

    # AdaptiveMask.size_ratio parameter (torch shape (nheads, 1, 1)); deterministic init.
    size_ratio_host = [0.4, 0.5]
    size_ratio = jnp.array(size_ratio_host, dtype=jnp.float32)
    # trim length is derived from host-side floats: static, no device sync, jittable.
    trim_len = compute_trim_len(max(size_ratio_host))

    out, aux_loss = seq_attention_forward(query, key_in, value_in, key_pe,
                                          size_ratio, trim_len=trim_len)
    out = jax.block_until_ready(out)

    ref = seq_attention_reference(query, key_in, value_in, key_pe, size_ratio, trim_len)
    assert out.shape == (B, M, H)
    assert bool(jnp.all(jnp.isfinite(out)))
    max_err = float(jnp.max(jnp.abs(out - ref)))
    assert jnp.allclose(out, ref, rtol=2e-2, atol=2e-2), max_err
    print("KERNEL_OK")
</pallas_src>

<mosaic_0001>
module attributes {stable_mosaic.version = 11 : i64} {
  func.func @_seq_attn_kernel(%arg0: i32, %arg1: memref<4xf32, #tpu.memory_space<smem>>, %arg2: memref<2x16x32xf32, #tpu.memory_space<vmem>>, %arg3: memref<2x64x32xf32, #tpu.memory_space<vmem>>, %arg4: memref<2x40x32xf32, #tpu.memory_space<vmem>>, %arg5: memref<1x16x64xf32, #tpu.memory_space<vmem>>) attributes {dimension_semantics = [#tpu.dimension_semantics<parallel>], iteration_bounds = array<i64: 2>, scalar_prefetch = 0 : i64, scratch_operands = 0 : i64, tpu.core_type = #tpu.core_type<tc>, window_params = [{transform_indices = @transform_0, window_bounds = array<i64: 4>}, {transform_indices = @transform_1, window_bounds = array<i64: 2, 16, 32>}, {transform_indices = @transform_2, window_bounds = array<i64: 2, 64, 32>}, {transform_indices = @transform_3, window_bounds = array<i64: 2, 40, 32>}, {transform_indices = @transform_4, window_bounds = array<i64: 1, 16, 64>}]} {
    %0 = tpu.iota {dimensions = array<i32: 0>} : vector<16x40xi32>
    %1 = tpu.iota {dimensions = array<i32: 1>} : vector<16x40xi32>
    %2 = arith.subi %1, %0 : vector<16x40xi32>
    %c0_i32 = arith.constant 0 : i32
    %3 = vector.broadcast %c0_i32 : i32 to vector<16x40xi32>
    %4 = arith.cmpi sge, %2, %3 : vector<16x40xi32>
    %c24_i32 = arith.constant 24 : i32
    %5 = vector.broadcast %c24_i32 : i32 to vector<16x40xi32>
    %6 = arith.cmpi slt, %2, %5 : vector<16x40xi32>
    %7 = arith.andi %4, %6 : vector<16x40xi1>
    %8 = arith.sitofp %2 : vector<16x40xi32> to vector<16x40xf32>
    %c0 = arith.constant 0 : index
    %c0_0 = arith.constant 0 : index
    %c0_1 = arith.constant 0 : index
    %9 = vector.load %arg2[%c0, %c0_0, %c0_1] : memref<2x16x32xf32, #tpu.memory_space<vmem>>, vector<1x16x32xf32>
    %10 = vector.shape_cast %9 : vector<1x16x32xf32> to vector<16x32xf32>
    %c0_2 = arith.constant 0 : index
    %c0_3 = arith.constant 0 : index
    %c0_4 = arith.constant 0 : index
    %11 = vector.load %arg3[%c0_2, %c0_3, %c0_4] : memref<2x64x32xf32, #tpu.memory_space<vmem>>, vector<1x64x32xf32>
    %12 = vector.shape_cast %11 : vector<1x64x32xf32> to vector<64x32xf32>
    %c0_5 = arith.constant 0 : index
    %c0_6 = arith.constant 0 : index
    %c0_7 = arith.constant 0 : index
    %13 = vector.load %arg4[%c0_5, %c0_6, %c0_7] : memref<2x40x32xf32, #tpu.memory_space<vmem>>, vector<1x40x32xf32>
    %14 = vector.shape_cast %13 : vector<1x40x32xf32> to vector<40x32xf32>
    %cst = arith.constant dense<0.000000e+00> : vector<16x64xf32>
    %15 = tpu.matmul %10, %12, %cst {dimension_numbers = #tpu.dot_dimension_numbers<[1], [1], [0], [0], [0, 0, 1, 0], [], []>} : vector<16x32xf32>, vector<64x32xf32>, vector<16x64xf32> -> vector<16x64xf32>
    %16 = vector.extract_strided_slice %15 {offsets = [0, 0], sizes = [16, 40], strides = [1, 1]} : vector<16x64xf32> to vector<16x40xf32>
    %17 = vector.extract_strided_slice %15 {offsets = [0, 40], sizes = [16, 24], strides = [1, 1]} : vector<16x64xf32> to vector<16x24xf32>
    %cst_8 = arith.constant 0.000000e+00 : f32
    %18 = vector.broadcast %cst_8 : f32 to vector<16x16xf32>
    %19 = tpu.concatenate %17, %18 in 1 : vector<16x24xf32>, vector<16x16xf32> -> vector<16x40xf32>
    %20 = tpu.iota {dimensions = array<i32: 0>} : vector<16x1xi32>
    %cst_9 = arith.constant 0.000000e+00 : f32
    %21 = vector.broadcast %cst_9 : f32 to vector<16x1xf32>
    %22 = vector.extract_strided_slice %19 {offsets = [0, 0], sizes = [16, 39], strides = [1, 1]} : vector<16x40xf32> to vector<16x39xf32>
    %23 = tpu.concatenate %21, %22 in 1 : vector<16x1xf32>, vector<16x39xf32> -> vector<16x40xf32>
    %c1_i32 = arith.constant 1 : i32
    %24 = vector.broadcast %c1_i32 : i32 to vector<16x1xi32>
    %25 = arith.andi %20, %24 : vector<16x1xi32>
    %c0_i32_10 = arith.constant 0 : i32
    %26 = vector.broadcast %c0_i32_10 : i32 to vector<16x1xi32>
    %27 = arith.cmpi ne, %25, %26 : vector<16x1xi32>
    %28 = vector.shape_cast %27 : vector<16x1xi1> to vector<16x1xi1>
    %29 = vector.broadcast %28 : vector<16x1xi1> to vector<16x40xi1>
    %30 = arith.select %29, %23, %19 : vector<16x40xi1>, vector<16x40xf32>
    %cst_11 = arith.constant 0.000000e+00 : f32
    %31 = vector.broadcast %cst_11 : f32 to vector<16x2xf32>
    %32 = vector.extract_strided_slice %30 {offsets = [0, 0], sizes = [16, 38], strides = [1, 1]} : vector<16x40xf32> to vector<16x38xf32>
    %33 = tpu.concatenate %31, %32 in 1 : vector<16x2xf32>, vector<16x38xf32> -> vector<16x40xf32>
    %c2_i32 = arith.constant 2 : i32
    %34 = vector.broadcast %c2_i32 : i32 to vector<16x1xi32>
    %35 = arith.andi %20, %34 : vector<16x1xi32>
    %c0_i32_12 = arith.constant 0 : i32
    %36 = vector.broadcast %c0_i32_12 : i32 to vector<16x1xi32>
    %37 = arith.cmpi ne, %35, %36 : vector<16x1xi32>
    %38 = vector.shape_cast %37 : vector<16x1xi1> to vector<16x1xi1>
    %39 = vector.broadcast %38 : vector<16x1xi1> to vector<16x40xi1>
    %40 = arith.select %39, %33, %30 : vector<16x40xi1>, vector<16x40xf32>
    %cst_13 = arith.constant 0.000000e+00 : f32
    %41 = vector.broadcast %cst_13 : f32 to vector<16x4xf32>
    %42 = vector.extract_strided_slice %40 {offsets = [0, 0], sizes = [16, 36], strides = [1, 1]} : vector<16x40xf32> to vector<16x36xf32>
    %43 = tpu.concatenate %41, %42 in 1 : vector<16x4xf32>, vector<16x36xf32> -> vector<16x40xf32>
    %c4_i32 = arith.constant 4 : i32
    %44 = vector.broadcast %c4_i32 : i32 to vector<16x1xi32>
    %45 = arith.andi %20, %44 : vector<16x1xi32>
    %c0_i32_14 = arith.constant 0 : i32
    %46 = vector.broadcast %c0_i32_14 : i32 to vector<16x1xi32>
    %47 = arith.cmpi ne, %45, %46 : vector<16x1xi32>
    %48 = vector.shape_cast %47 : vector<16x1xi1> to vector<16x1xi1>
    %49 = vector.broadcast %48 : vector<16x1xi1> to vector<16x40xi1>
    %50 = arith.select %49, %43, %40 : vector<16x40xi1>, vector<16x40xf32>
    %cst_15 = arith.constant 0.000000e+00 : f32
    %51 = vector.broadcast %cst_15 : f32 to vector<16x8xf32>
    %52 = vector.extract_strided_slice %50 {offsets = [0, 0], sizes = [16, 32], strides = [1, 1]} : vector<16x40xf32> to vector<16x32xf32>
    %53 = tpu.concatenate %51, %52 in 1 : vector<16x8xf32>, vector<16x32xf32> -> vector<16x40xf32>
    %c8_i32 = arith.constant 8 : i32
    %54 = vector.broadcast %c8_i32 : i32 to vector<16x1xi32>
    %55 = arith.andi %20, %54 : vector<16x1xi32>
    %c0_i32_16 = arith.constant 0 : i32
    %56 = vector.broadcast %c0_i32_16 : i32 to vector<16x1xi32>
    %57 = arith.cmpi ne, %55, %56 : vector<16x1xi32>
    %58 = vector.shape_cast %57 : vector<16x1xi1> to vector<16x1xi1>
    %59 = vector.broadcast %58 : vector<16x1xi1> to vector<16x40xi1>
    %60 = arith.select %59, %53, %50 : vector<16x40xi1>, vector<16x40xf32>
    %61 = arith.addf %16, %60 : vector<16x40xf32>
    %cst_17 = arith.constant 0.176776692 : f32
    %62 = vector.broadcast %cst_17 : f32 to vector<16x40xf32>
    %63 = arith.mulf %61, %62 : vector<16x40xf32>
    %cst_18 = arith.constant -1.000000e+30 : f32
    %64 = vector.broadcast %cst_18 : f32 to vector<16x40xf32>
    %65 = arith.select %7, %63, %64 : vector<16x40xi1>, vector<16x40xf32>
    %cst_19 = arith.constant dense<0xFF800000> : vector<16xf32>
    %66 = vector.multi_reduction <maximumf>, %65, %cst_19 [1] : vector<16x40xf32> to vector<16xf32>
    %67 = vector.shape_cast %66 : vector<16xf32> to vector<16x1xf32>
    %68 = vector.broadcast %67 : vector<16x1xf32> to vector<16x40xf32>
    %69 = arith.subf %65, %68 : vector<16x40xf32>
    %70 = math.exp %69 : vector<16x40xf32>
    %cst_20 = arith.constant 0.000000e+00 : f32
    %71 = vector.broadcast %cst_20 : f32 to vector<16x40xf32>
    %72 = arith.select %7, %70, %71 : vector<16x40xi1>, vector<16x40xf32>
    %c2_i32_21 = arith.constant 2 : i32
    %73 = arith.muli %arg0, %c2_i32_21 : i32
    %c0_i32_22 = arith.constant 0 : i32
    %74 = arith.addi %73, %c0_i32_22 : i32
    %75 = arith.index_cast %74 : i32 to index
    %76 = memref.load %arg1[%75] : memref<4xf32, #tpu.memory_space<smem>>
    %cst_23 = arith.constant 4.000000e+00 : f32
    %77 = arith.mulf %76, %cst_23 : f32
    %cst_24 = arith.constant 2.875000e+00 : f32
    %78 = arith.subf %77, %cst_24 : f32
    %cst_25 = arith.constant 1.000000e+00 : f32
    %79 = arith.addf %78, %cst_25 : f32
    %cst_26 = arith.constant 1.250000e-01 : f32
    %80 = vector.broadcast %cst_26 : f32 to vector<16x40xf32>
    %81 = arith.mulf %8, %80 : vector<16x40xf32>
    %82 = vector.broadcast %79 : f32 to vector<16x40xf32>
    %83 = arith.addf %81, %82 : vector<16x40xf32>
    %cst_27 = arith.constant 0.000000e+00 : f32
    %cst_28 = arith.constant 1.000000e+00 : f32
    %84 = vector.broadcast %cst_27 : f32 to vector<16x40xf32>
    %85 = arith.maximumf %84, %83 : vector<16x40xf32>
    %86 = vector.broadcast %cst_28 : f32 to vector<16x40xf32>
    %87 = arith.minimumf %86, %85 : vector<16x40xf32>
    %88 = arith.mulf %72, %87 : vector<16x40xf32>
    %cst_29 = arith.constant dense<0.000000e+00> : vector<16xf32>
    %89 = vector.multi_reduction <add>, %88, %cst_29 [1] : vector<16x40xf32> to vector<16xf32>
    %90 = vector.shape_cast %89 : vector<16xf32> to vector<16x1xf32>
    %cst_30 = arith.constant 9.99999993E-9 : f32
    %91 = vector.broadcast %cst_30 : f32 to vector<16x1xf32>
    %92 = arith.addf %90, %91 : vector<16x1xf32>
    %93 = tpu.reciprocal %92 {approx = true} : vector<16x1xf32> -> vector<16x1xf32>
    %94 = vector.broadcast %93 : vector<16x1xf32> to vector<16x40xf32>
    %95 = arith.mulf %88, %94 : vector<16x40xf32>
    %cst_31 = arith.constant dense<0.000000e+00> : vector<16x32xf32>
    %96 = tpu.matmul %95, %14, %cst_31 {dimension_numbers = #tpu.dot_dimension_numbers<[1], [0], [0], [1], [0, 0, 1, 1], [], []>} : vector<16x40xf32>, vector<40x32xf32>, vector<16x32xf32> -> vector<16x32xf32>
    %c1 = arith.constant 1 : index
    %c0_32 = arith.constant 0 : index
    %c0_33 = arith.constant 0 : index
    %97 = vector.load %arg2[%c1, %c0_32, %c0_33] : memref<2x16x32xf32, #tpu.memory_space<vmem>>, vector<1x16x32xf32>
    %98 = vector.shape_cast %97 : vector<1x16x32xf32> to vector<16x32xf32>
    %c1_34 = arith.constant 1 : index
    %c0_35 = arith.constant 0 : index
    %c0_36 = arith.constant 0 : index
    %99 = vector.load %arg3[%c1_34, %c0_35, %c0_36] : memref<2x64x32xf32, #tpu.memory_space<vmem>>, vector<1x64x32xf32>
    %100 = vector.shape_cast %99 : vector<1x64x32xf32> to vector<64x32xf32>
    %c1_37 = arith.constant 1 : index
    %c0_38 = arith.constant 0 : index
    %c0_39 = arith.constant 0 : index
    %101 = vector.load %arg4[%c1_37, %c0_38, %c0_39] : memref<2x40x32xf32, #tpu.memory_space<vmem>>, vector<1x40x32xf32>
    %102 = vector.shape_cast %101 : vector<1x40x32xf32> to vector<40x32xf32>
    %cst_40 = arith.constant dense<0.000000e+00> : vector<16x64xf32>
    %103 = tpu.matmul %98, %100, %cst_40 {dimension_numbers = #tpu.dot_dimension_numbers<[1], [1], [0], [0], [0, 0, 1, 0], [], []>} : vector<16x32xf32>, vector<64x32xf32>, vector<16x64xf32> -> vector<16x64xf32>
    %104 = vector.extract_strided_slice %103 {offsets = [0, 0], sizes = [16, 40], strides = [1, 1]} : vector<16x64xf32> to vector<16x40xf32>
    %105 = vector.extract_strided_slice %103 {offsets = [0, 40], sizes = [16, 24], strides = [1, 1]} : vector<16x64xf32> to vector<16x24xf32>
    %cst_41 = arith.constant 0.000000e+00 : f32
    %106 = vector.broadcast %cst_41 : f32 to vector<16x16xf32>
    %107 = tpu.concatenate %105, %106 in 1 : vector<16x24xf32>, vector<16x16xf32> -> vector<16x40xf32>
    %108 = tpu.iota {dimensions = array<i32: 0>} : vector<16x1xi32>
    %cst_42 = arith.constant 0.000000e+00 : f32
    %109 = vector.broadcast %cst_42 : f32 to vector<16x1xf32>
    %110 = vector.extract_strided_slice %107 {offsets = [0, 0], sizes = [16, 39], strides = [1, 1]} : vector<16x40xf32> to vector<16x39xf32>
    %111 = tpu.concatenate %109, %110 in 1 : vector<16x1xf32>, vector<16x39xf32> -> vector<16x40xf32>
    %c1_i32_43 = arith.constant 1 : i32
    %112 = vector.broadcast %c1_i32_43 : i32 to vector<16x1xi32>
    %113 = arith.andi %108, %112 : vector<16x1xi32>
    %c0_i32_44 = arith.constant 0 : i32
    %114 = vector.broadcast %c0_i32_44 : i32 to vector<16x1xi32>
    %115 = arith.cmpi ne, %113, %114 : vector<16x1xi32>
    %116 = vector.shape_cast %115 : vector<16x1xi1> to vector<16x1xi1>
    %117 = vector.broadcast %116 : vector<16x1xi1> to vector<16x40xi1>
    %118 = arith.select %117, %111, %107 : vector<16x40xi1>, vector<16x40xf32>
    %cst_45 = arith.constant 0.000000e+00 : f32
    %119 = vector.broadcast %cst_45 : f32 to vector<16x2xf32>
    %120 = vector.extract_strided_slice %118 {offsets = [0, 0], sizes = [16, 38], strides = [1, 1]} : vector<16x40xf32> to vector<16x38xf32>
    %121 = tpu.concatenate %119, %120 in 1 : vector<16x2xf32>, vector<16x38xf32> -> vector<16x40xf32>
    %c2_i32_46 = arith.constant 2 : i32
    %122 = vector.broadcast %c2_i32_46 : i32 to vector<16x1xi32>
    %123 = arith.andi %108, %122 : vector<16x1xi32>
    %c0_i32_47 = arith.constant 0 : i32
    %124 = vector.broadcast %c0_i32_47 : i32 to vector<16x1xi32>
    %125 = arith.cmpi ne, %123, %124 : vector<16x1xi32>
    %126 = vector.shape_cast %125 : vector<16x1xi1> to vector<16x1xi1>
    %127 = vector.broadcast %126 : vector<16x1xi1> to vector<16x40xi1>
    %128 = arith.select %127, %121, %118 : vector<16x40xi1>, vector<16x40xf32>
    %cst_48 = arith.constant 0.000000e+00 : f32
    %129 = vector.broadcast %cst_48 : f32 to vector<16x4xf32>
    %130 = vector.extract_strided_slice %128 {offsets = [0, 0], sizes = [16, 36], strides = [1, 1]} : vector<16x40xf32> to vector<16x36xf32>
    %131 = tpu.concatenate %129, %130 in 1 : vector<16x4xf32>, vector<16x36xf32> -> vector<16x40xf32>
    %c4_i32_49 = arith.constant 4 : i32
    %132 = vector.broadcast %c4_i32_49 : i32 to vector<16x1xi32>
    %133 = arith.andi %108, %132 : vector<16x1xi32>
    %c0_i32_50 = arith.constant 0 : i32
    %134 = vector.broadcast %c0_i32_50 : i32 to vector<16x1xi32>
    %135 = arith.cmpi ne, %133, %134 : vector<16x1xi32>
    %136 = vector.shape_cast %135 : vector<16x1xi1> to vector<16x1xi1>
    %137 = vector.broadcast %136 : vector<16x1xi1> to vector<16x40xi1>
    %138 = arith.select %137, %131, %128 : vector<16x40xi1>, vector<16x40xf32>
    %cst_51 = arith.constant 0.000000e+00 : f32
    %139 = vector.broadcast %cst_51 : f32 to vector<16x8xf32>
    %140 = vector.extract_strided_slice %138 {offsets = [0, 0], sizes = [16, 32], strides = [1, 1]} : vector<16x40xf32> to vector<16x32xf32>
    %141 = tpu.concatenate %139, %140 in 1 : vector<16x8xf32>, vector<16x32xf32> -> vector<16x40xf32>
    %c8_i32_52 = arith.constant 8 : i32
    %142 = vector.broadcast %c8_i32_52 : i32 to vector<16x1xi32>
    %143 = arith.andi %108, %142 : vector<16x1xi32>
    %c0_i32_53 = arith.constant 0 : i32
    %144 = vector.broadcast %c0_i32_53 : i32 to vector<16x1xi32>
    %145 = arith.cmpi ne, %143, %144 : vector<16x1xi32>
    %146 = vector.shape_cast %145 : vector<16x1xi1> to vector<16x1xi1>
    %147 = vector.broadcast %146 : vector<16x1xi1> to vector<16x40xi1>
    %148 = arith.select %147, %141, %138 : vector<16x40xi1>, vector<16x40xf32>
    %149 = arith.addf %104, %148 : vector<16x40xf32>
    %cst_54 = arith.constant 0.176776692 : f32
    %150 = vector.broadcast %cst_54 : f32 to vector<16x40xf32>
    %151 = arith.mulf %149, %150 : vector<16x40xf32>
    %cst_55 = arith.constant -1.000000e+30 : f32
    %152 = vector.broadcast %cst_55 : f32 to vector<16x40xf32>
    %153 = arith.select %7, %151, %152 : vector<16x40xi1>, vector<16x40xf32>
    %cst_56 = arith.constant dense<0xFF800000> : vector<16xf32>
    %154 = vector.multi_reduction <maximumf>, %153, %cst_56 [1] : vector<16x40xf32> to vector<16xf32>
    %155 = vector.shape_cast %154 : vector<16xf32> to vector<16x1xf32>
    %156 = vector.broadcast %155 : vector<16x1xf32> to vector<16x40xf32>
    %157 = arith.subf %153, %156 : vector<16x40xf32>
    %158 = math.exp %157 : vector<16x40xf32>
    %cst_57 = arith.constant 0.000000e+00 : f32
    %159 = vector.broadcast %cst_57 : f32 to vector<16x40xf32>
    %160 = arith.select %7, %158, %159 : vector<16x40xi1>, vector<16x40xf32>
    %c2_i32_58 = arith.constant 2 : i32
    %161 = arith.muli %arg0, %c2_i32_58 : i32
    %c1_i32_59 = arith.constant 1 : i32
    %162 = arith.addi %161, %c1_i32_59 : i32
    %163 = arith.index_cast %162 : i32 to index
    %164 = memref.load %arg1[%163] : memref<4xf32, #tpu.memory_space<smem>>
    %cst_60 = arith.constant 4.000000e+00 : f32
    %165 = arith.mulf %164, %cst_60 : f32
    %cst_61 = arith.constant 2.875000e+00 : f32
    %166 = arith.subf %165, %cst_61 : f32
    %cst_62 = arith.constant 1.000000e+00 : f32
    %167 = arith.addf %166, %cst_62 : f32
    %cst_63 = arith.constant 1.250000e-01 : f32
    %168 = vector.broadcast %cst_63 : f32 to vector<16x40xf32>
    %169 = arith.mulf %8, %168 : vector<16x40xf32>
    %170 = vector.broadcast %167 : f32 to vector<16x40xf32>
    %171 = arith.addf %169, %170 : vector<16x40xf32>
    %cst_64 = arith.constant 0.000000e+00 : f32
    %cst_65 = arith.constant 1.000000e+00 : f32
    %172 = vector.broadcast %cst_64 : f32 to vector<16x40xf32>
    %173 = arith.maximumf %172, %171 : vector<16x40xf32>
    %174 = vector.broadcast %cst_65 : f32 to vector<16x40xf32>
    %175 = arith.minimumf %174, %173 : vector<16x40xf32>
    %176 = arith.mulf %160, %175 : vector<16x40xf32>
    %cst_66 = arith.constant dense<0.000000e+00> : vector<16xf32>
    %177 = vector.multi_reduction <add>, %176, %cst_66 [1] : vector<16x40xf32> to vector<16xf32>
    %178 = vector.shape_cast %177 : vector<16xf32> to vector<16x1xf32>
    %cst_67 = arith.constant 9.99999993E-9 : f32
    %179 = vector.broadcast %cst_67 : f32 to vector<16x1xf32>
    %180 = arith.addf %178, %179 : vector<16x1xf32>
    %181 = tpu.reciprocal %180 {approx = true} : vector<16x1xf32> -> vector<16x1xf32>
    %182 = vector.broadcast %181 : vector<16x1xf32> to vector<16x40xf32>
    %183 = arith.mulf %176, %182 : vector<16x40xf32>
    %cst_68 = arith.constant dense<0.000000e+00> : vector<16x32xf32>
    %184 = tpu.matmul %183, %102, %cst_68 {dimension_numbers = #tpu.dot_dimension_numbers<[1], [0], [0], [1], [0, 0, 1, 1], [], []>} : vector<16x40xf32>, vector<40x32xf32>, vector<16x32xf32> -> vector<16x32xf32>
    %185 = tpu.concatenate %96, %184 in 1 : vector<16x32xf32>, vector<16x32xf32> -> vector<16x64xf32>
    %c0_69 = arith.constant 0 : index
    %c0_70 = arith.constant 0 : index
    %c0_71 = arith.constant 0 : index
    %186 = vector.load %arg5[%c0_69, %c0_70, %c0_71] : memref<1x16x64xf32, #tpu.memory_space<vmem>>, vector<1x16x64xf32>
    %187 = vector.shape_cast %186 : vector<1x16x64xf32> to vector<16x64xf32>
    %188 = vector.shape_cast %185 : vector<16x64xf32> to vector<1x16x64xf32>
    tpu.vector_store %arg5[%c0_69, %c0_70, %c0_71], %188 {strides = array<i32>} : memref<1x16x64xf32, #tpu.memory_space<vmem>>, vector<1x16x64xf32>,
    return
  }
  func.func @transform_0(%arg0: i32) -> i32 {
    %c0_i32 = arith.constant 0 : i32
    %c0_i32_0 = arith.constant 0 : i32
    return %c0_i32 : i32
  }
  func.func @transform_1(%arg0: i32) -> (i32, i32, i32) {
    %c0_i32 = arith.constant 0 : i32
    %c0_i32_0 = arith.constant 0 : i32
    %c0_i32_1 = arith.constant 0 : i32
    return %arg0, %c0_i32, %c0_i32_0 : i32, i32, i32
  }
  func.func @transform_2(%arg0: i32) -> (i32, i32, i32) {
    %c0_i32 = arith.constant 0 : i32
    %c0_i32_0 = arith.constant 0 : i32
    %c0_i32_1 = arith.constant 0 : i32
    return %arg0, %c0_i32, %c0_i32_0 : i32, i32, i32
  }
  func.func @transform_3(%arg0: i32) -> (i32, i32, i32) {
    %c0_i32 = arith.constant 0 : i32
    %c0_i32_0 = arith.constant 0 : i32
    %c0_i32_1 = arith.constant 0 : i32
    return %arg0, %c0_i32, %c0_i32_0 : i32, i32, i32
  }
  func.func @transform_4(%arg0: i32) -> (i32, i32, i32) {
    %c0_i32 = arith.constant 0 : i32
    %c0_i32_0 = arith.constant 0 : i32
    %c0_i32_1 = arith.constant 0 : i32
    return %arg0, %c0_i32, %c0_i32_0 : i32, i32, i32
  }
}

</mosaic_0001>

<bundles_post_ra>
// kernel: tile.8
= control target key start
LH: loop header
LB: loop body
LE: loop exit
PB: predicated region body
PF: predicated region fallthrough
CT: control target
= control target key end

     0   :  { %s22_s0 = inlined_call_operand.vmem [shape: f32[2], index: 0, kind: input, shape index: {}]   ;;  %s23_s1 = inlined_call_operand.vmem [shape: f32[2,2], index: 1, kind: output, shape index: {}]  }
   0x1   :  { %v4_v0 = vld [vmem:[%s22_s0] ss:$0 sm:$0xff] }
   0x2   :  { %5 = vst [vmem:[%s23_s1] sm:$0x3] %v4_v0 }

// kernel: tile.9
= control target key start
LH: loop header
LB: loop body
LE: loop exit
PB: predicated region body
PF: predicated region fallthrough
CT: control target
= control target key end

     0   :  { %vm7_vm0 = vcmask 15360   ;;  %vm13_vm1 = vcmask 31760   ;;  %s39_s0 = inlined_call_operand.vmem [shape: f32[2,2], index: 0, kind: input, shape index: {}]   ;;  %s40_s1 = inlined_call_operand.vmem [shape: f32[4], index: 1, kind: output, shape index: {}]  }
   0x1   :  { %v4_v0 = vld [vmem:[%s39_s0] sm:$0x3]  ;;  %s22_s0 = smov 2  }
   0x2   :  { %5 = vst [vmem:[#allocation1] sm:$0x3] %v4_v0 }
   0x9   :  { %v10_v1 = vld [vmem:[#allocation1 + $0x1] sm:$0x1]   ;;  %v6_v2 = vld [vmem:[#allocation1] sm:$0x1]  }
   0xa   :  { %11 = vrot.lane.b32.xlu0 %v10_v1, %s22_s0  ;;  %8 = vst.msk [vmem:[#allocation0] sm:$0x1] %vm7_vm0, %v6_v2  }
  0x7c   :  { %v12_v3 = vpop.permute.xlu0 %11  }
  0x7d   :  { %14 = vst.msk [vmem:[#allocation0] sm:$0x1] %vm13_vm1, %v12_v3  }
  0x84   :  { %v18_v4 = vld [vmem:[#allocation0] sm:$0x1] }
  0x85   :  { %20 = vst [vmem:[%s40_s1] sm:$0x1] %v18_v4 }

// kernel: seq_attention_forward.1
= control target key start
LH: loop header
LB: loop body
LE: loop exit
PB: predicated region body
PF: predicated region fallthrough
CT: control target
= control target key end

     0   :  { %9 = vsyncpa [#allocation3], 0  ;;  %s1367_s15 = smov 0   ;;  %s1642_s0 = inlined_call_operand.vmem [shape: f32[4], index: 0, kind: input, shape index: {}]   ;;  %s1643_s1 = inlined_call_operand.vmem [shape: f32[4,16,32], index: 1, kind: input, shape index: {}]   ;;  %s1644_s2 = inlined_call_operand.vmem [shape: f32[4,64,32], index: 2, kind: input, shape index: {}]   ;;  %s1645_s3 = inlined_call_operand.vmem [shape: f32[4,40,32], index: 3, kind: input, shape index: {}]   ;;  %s1646_s4 = inlined_call_operand.vmem [shape: f32[2,16,64], index: 4, kind: output, shape index: {}]  }
   0x1 LB: > { %s1373_s16 = sadd.s32 4294967295, %s1333_s15   ;;  %p1042_p0 = scmp.ge.s32.totalorder %s1333_s15, 1  ;;  %s1333_s15 = sphi %s1367_s15, %s15_s15  }
   0x2   : > { %p145_p1 = scmp.lt.s32.totalorder %s1333_s15, 3  ;;  %s158_s19 = sshll.u32 %s1642_s0, 4  ;;  %s159_s19 = int_to_ptr.vmem [resolvable:$true] %s158_s19 }
   0x3   : > { %p1275_p3 = scmp.eq.s32.totalorder %s1373_s16, 0  ;;  %s1308_s21 = scalar_lea.vmem %s159_s19, 16 }
   0x4   : > { %p1380_p2 = pnand %p1042_p0, %p145_p1  ;;  %p1309_p6 = scmp.ne.s32.totalorder %s159_s19, %s1308_s21 }
   0x5   : > { %p1316_p10 = scmp.lt.s32.totalorder %s159_s19, %s159_s19  ;;  %p1317_p11 = scmp.lt.s32.totalorder %s1308_s21, %s1308_s21 }
   0x6   : > { %p1271_p4 = pneg %p1380_p2 }
   0x7   : > { %p1318_p12 = por %p1317_p11, %p1316_p10 }
   0x8   : > { %p1272_p5 = pnand %p1275_p3, %p1271_p4 }
   0xa   : > { %p1310_p7 = pneg %p1272_p5 }
   0xc   : > { %p1311_p8 = pnand %p1310_p7, %p1309_p6 }
   0xe   : > { %p1312_p9 = pneg %p1311_p8 }
  0x10   : > { %p1319_p13 = pnand %p1318_p12, %p1312_p9 }
  0x12   : > { %1322 = shalt.err (!%p1319_p13)
}
  0x13   : > { %s1335_s22 = smov [#allocation2]   ;;  %201 = sbr.rel (%p1380_p2) target bundleno = 2671 (0xa6f), region = 36 }
  0x14   : > { %1274 = dma.vmem_to_smem (!%p1272_p5), %s159_s19, 16, %s1335_s22, [#allocation3]  }
  0x1a   : > { %1328 = dma.done.wait (%p1275_p3), [#allocation3], 16  }
  0x1b   : > { %1330 = vsyncadd (%p1275_p3), [#allocation3], 4294967280 }
  0x1c   : > { %207 = sfence }
  0x1d   : > { %s1396_s23 = sshll.u32 %s1373_s16, 1  ;;  %vm297_vm0 = vcmask 261120   ;;  %s1336_s7 = smov 88   ;;  %vm411_vm2 = vcmask 195584   ;;  %v267_v21 = vlaneseq  ;;  %vm1649_vm3 = vcmask 7168  }
  0x1e   : > { %p242_p0 = scmp.lt.s32.totalorder %s1396_s23, 3  ;;  %vm1411_vm1 = vmpackc.low %vm297_vm0, %vm297_vm0  ;;  %s1337_s8 = smov 1   ;;  %vm1648_vm6 = vcmask 15360   ;;  %vm1647_vm9 = vcmask 31744   ;;  %vm504_vm15 = vcmask 326656  }
  0x1f   : > { %v268_v22 = vshrl.u32 %v267_v21, 7  ;;  %s1338_s9 = smov 2   ;;  %s1339_s10 = smov 4   ;;  %v271_v45 = vand.u32 127, %v267_v21 }
  0x20   : > { %s1400_s24 = scalar_select %p242_p0, %s1396_s23, 3 }
  0x21   : > { %v269_v23 = vadd.s32 8, %v268_v22  ;;  %v425_v26 = vand.u32 1, %v268_v22  ;;  %v446_v36 = vand.u32 2, %v268_v22  ;;  %v467_v47 = vand.u32 4, %v268_v22  ;;  %s1340_s11 = smov 8   ;;  %s520_s12 = sld [smem:[#allocation2 + %s1396_s23]] }
  0x22   : > { %s1102_s25 = sshll.u32 %s1400_s24, 6  ;;  %s1101_s26 = sshll.u32 %s1400_s24, 4  ;;  %v272_v50 = vsub.s32 %v271_v45, %v268_v22 }
  0x23   : > { %s1407_s29 = scalar_lea.vmem %s1644_s2, %s1102_s25  ;;  %s1418_s6 = scalar_lea.vmem %s1643_s1, %s1101_s26  ;;  %v426_v24 = vand.u32 1, %v269_v23  ;;  %vm1465_vm5 = vcmp.ne.s32.totalorder %v425_v26, 0  ;;  %v447_v34 = vand.u32 2, %v269_v23  ;;  %vm1481_vm8 = vcmp.ne.s32.totalorder %v446_v36, 0 }
  0x24   : > { %v284_v1 = vld [vmem:[%s1407_s29] sm:$0xff]  ;;  %v285_v2 = vld [vmem:[%s1407_s29 + $0x8] sm:$0xff]  ;;  %v286_v3 = vld [vmem:[%s1407_s29 + $0x10] sm:$0xff]  ;;  %v468_v44 = vand.u32 4, %v269_v23  ;;  %vm1497_vm11 = vcmp.ne.s32.totalorder %v467_v47, 0  ;;  %vm274_vm12 = vcmp.ge.s32.totalorder %v272_v50, 0  ;;  %v273_v61 = vsub.s32 %v271_v45, %v269_v23 }
  0x25   : > { %v1202_v4 = vpack.c.bf16 %v285_v2, %v284_v1  ;;  %v287_v5 = vld [vmem:[%s1407_s29 + $0x18] sm:$0xff]  ;;  %v282_v7 = vld [vmem:[%s1418_s6] sm:$0xff]  ;;  %v289_v9 = vld [vmem:[%s1407_s29 + $0x28] sm:$0xff]  ;;  %vm1457_vm4 = vcmp.ne.s32.totalorder %v426_v24, 0  ;;  %vm1473_vm7 = vcmp.ne.s32.totalorder %v447_v34, 0  ;;  %vm276_vm13 = vcmp.lt.s32.totalorder %v272_v50, 24 }
  0x26   : > { %v1208_v6 = vpack.c.bf16 %v287_v5, %v286_v3  ;;  %1154 = vmatprep.mubr.msk.f32.mxu0 %vm297_vm0, %v282_v7  ;;  %v288_v8 = vld [vmem:[%s1407_s29 + $0x20] sm:$0xff]  ;;  %v290_v11 = vld [vmem:[%s1407_s29 + $0x30] sm:$0xff]  ;;  %v291_v12 = vld [vmem:[%s1407_s29 + $0x38] sm:$0xff]  ;;  %vm1489_vm10 = vcmp.ne.s32.totalorder %v468_v44, 0  ;;  %s1266_s18 = smul.u32 40, %s1400_s24  ;;  %v281_v22 = vcvt.s32.f32 %v273_v61  ;;  %s829_s22 = sadd.s32 1, %s1396_s23 }
  0x27   : > { %1204 = vmatprep.subr.msk.bf16.mxu0 %vm1411_vm1, %v1202_v4  ;;  %v1214_v10 = vpack.c.bf16 %v289_v9, %v288_v8  ;;  %v1220_v13 = vpack.c.bf16 %v291_v12, %v290_v11  ;;  %v283_v14 = vld [vmem:[%s1418_s6 + $0x8] sm:$0xff]  ;;  %vm1504_vm14 = vmand %vm274_vm12, %vm276_vm13  ;;  %s521_s13 = smul.f32 4.0, %s520_s12  ;;  %s830_s24 = sld [smem:[#allocation2 + %s829_s22]] }
  0x28   : > { %1207 = vmatpush3.bf16.xpose.msk.msra.mxu0 %vm1411_vm1, %v1202_v4  ;;  %s1531_s21 = scalar_lea.vmem %s1645_s3, %s1266_s18  ;;  %v1535_v26 = vmul.f32 0.125, %v281_v22  ;;  %s1341_s23 = smov 32  }
  0x29   : > { %1210 = vmatprep.subr.msk.bf16.mxu0 %vm1411_vm1, %v1208_v6  ;;  %s1068_s14 = sadd.f32 -2.875, %s521_s13  ;;  %p262_p1 = scmp.lt.s32.totalorder %s1373_s16, 1 }
  0x2b   : > { %s523_s17 = sadd.f32 1.0, %s1068_s14  ;;  %s1676_s16 = smov (!%p262_p1, %s1373_s16), 1 }
  0x2c   : > { %s1103_s28 = sshll.u32 %s1676_s16, 4 }
  0x2d   : > { %s831_s25 = smul.f32 4.0, %s830_s24  ;;  %s266_s5 = scalar_lea.vmem %s1646_s4, %s1103_s28 }
  0x2f   : > { %s1096_s26 = sadd.f32 -2.875, %s831_s25 }
  0x30   : > { %1213 = vmatpush3.bf16.xpose.msk.msra.mxu0 %vm1411_vm1, %v1208_v6  ;;  %v280_v6 = vcvt.s32.f32 %v272_v50 }
  0x31   : > { %1216 = vmatprep.subr.msk.bf16.mxu0 %vm1411_vm1, %v1214_v10  ;;  %s833_s27 = sadd.f32 1.0, %s1096_s26 }
  0x32   : > { %v1521_v9 = vmul.f32 0.125, %v280_v6 }
  0x38   : > { %1219 = vmatpush3.bf16.xpose.msk.msra.mxu0 %vm1411_vm1, %v1214_v10  ;;  %v526_v10 = vstv %s523_s17 }
  0x39   : > { %1222 = vmatprep.subr.msk.bf16.mxu0 %vm1411_vm1, %v1220_v13  ;;  %v527_v12 = vadd.f32 %v526_v10, %v1521_v9 }
  0x40   : > { %1225 = vmatpush3.bf16.xpose.msk.msra.mxu0 %vm1411_vm1, %v1220_v13  ;;  %v529_v13 = vmax.f32 %v527_v12, 0.0 }
  0x47   : > { %1155 = vmatmul.mubr.msk.f32.vlgmr.msra.gmra.mrb[0].mxu0 %vm297_vm0, %v283_v14  ;;  %v531_v14 = vmin.f32 %v529_v13, 1.0 }
 0x11a   : > { %v1448_v15 = vpop.f32.mrb[0].mxu0 }
 0x11b   : > { %407 = vrot.lane.b32.xlu0 %v1448_v15, %s1336_s7  ;;  %v394_v16 = vpop.f32.mrb[1].mxu0 }
 0x11f   : > { %405 = vrot.lane.b32.xlu0 %v394_v16, %s1336_s7 }
 0x18d   : > { %v408_v17 = vpop.permute.xlu0 %407 }
 0x18e   : > { %v413_v18 = vsel %vm411_vm2, %v408_v17, 0.0 }
 0x18f   : > { %418 = vrot.lane.b32.xlu1 %v413_v18, %s1337_s8 }
 0x191   : > { %v406_v19 = vpop.permute.xlu0 %405 }
 0x192   : > { %v412_v20 = vsel %vm411_vm2, %v406_v19, 0.0  ;;  %v292_v19 = vld [vmem:[%s1531_s21] sm:$0xff] }
 0x193   : > { %416 = vrot.lane.b32.xlu1 %v412_v20, %s1337_s8 }
 0x201   : > { %v419_v27 = vpop.permute.xlu1 %418 }
 0x202   : > { %v424_v28 = vsel %vm1649_vm3, 0.0, %v419_v27 }
 0x203   : > { %v434_v29 = vsel %vm1457_vm4, %v424_v28, %v413_v18  ;;  %v528_v28 = vadd.f32 %v526_v10, %v1535_v26 }
 0x204   : > { %439 = vrot.lane.b32.xlu0 %v434_v29, %s1338_s9 }
 0x205   : > { %v417_v31 = vpop.permute.xlu1 %416 }
 0x206   : > { %v423_v32 = vsel %vm1649_vm3, 0.0, %v417_v31  ;;  %vm277_vm3 = vcmp.lt.s32.totalorder %v273_v61, 24 }
 0x207   : > { %v433_v33 = vsel %vm1465_vm5, %v423_v32, %v412_v20  ;;  %v293_v20 = vld [vmem:[%s1531_s21 + $0x8] sm:$0xff] }
 0x208   : > { %437 = vrot.lane.b32.xlu1 %v433_v33, %s1338_s9  ;;  %v1226_v21 = vpack.c.bf16 %v293_v20, %v292_v19 }
 0x20a   : > { %1227 = vmatprep.subr.bf16.mxu1 %v1226_v21 }
 0x20b   : > { %1229 = vmatpush3.bf16.msra.mxu1 %v1226_v21 }
 0x276   : > { %v440_v37 = vpop.permute.xlu0 %439 }
 0x277   : > { %v445_v38 = vsel %vm1648_vm6, 0.0, %v440_v37  ;;  %v294_v37 = vld [vmem:[%s1531_s21 + $0x10] sm:$0xff] }
 0x278   : > { %v455_v39 = vsel %vm1473_vm7, %v445_v38, %v434_v29  ;;  %v530_v29 = vmax.f32 %v528_v28, 0.0  ;;  %v295_v38 = vld [vmem:[%s1531_s21 + $0x18] sm:$0xff] }
 0x279   : > { %460 = vrot.lane.b32.xlu0 %v455_v39, %s1339_s10 }
 0x27a   : > { %v438_v41 = vpop.permute.xlu1 %437  ;;  %v532_v31 = vmin.f32 %v530_v29, 1.0 }
 0x27b   : > { %v444_v42 = vsel %vm1648_vm6, 0.0, %v438_v41  ;;  %vm275_vm6 = vcmp.ge.s32.totalorder %v273_v61, 0  ;;  %v296_v41 = vld [vmem:[%s1531_s21 + $0x20] sm:$0xff]  ;;  %v1078_v61 = vld [vmem:[%s1407_s29 + $0x68] sm:$0xff] }
 0x27c   : > { %v454_v43 = vsel %vm1481_vm8, %v444_v42, %v433_v33  ;;  %vm1513_vm12 = vmand %vm275_vm6, %vm277_vm3  ;;  %v1073_v42 = vld [vmem:[%s1407_s29 + $0x40] sm:$0xff] }
 0x27d   : > { %458 = vrot.lane.b32.xlu1 %v454_v43, %s1339_s10 }
 0x2eb   : > { %v461_v48 = vpop.permute.xlu0 %460 }
 0x2ec   : > { %v466_v49 = vsel %vm1647_vm9, 0.0, %v461_v48 }
 0x2ed   : > { %v476_v51 = vsel %vm1489_vm10, %v466_v49, %v455_v39  ;;  %v1230_v39 = vpack.c.bf16 %v295_v38, %v294_v37 }
 0x2ee   : > { %481 = vrot.lane.b32.xlu0 %v476_v51, %s1340_s11 }
 0x2ef   : > { %v459_v53 = vpop.permute.xlu1 %458  ;;  %1231 = vmatprep.subr.bf16.mxu1 %v1230_v39 }
 0x2f0   : > { %v465_v54 = vsel %vm1647_vm9, 0.0, %v459_v53  ;;  %vm485_vm9 = vcmask 64512   ;;  %1233 = vmatpush3.bf16.msra.mxu1 %v1230_v39  ;;  %v1075_v53 = vld [vmem:[%s1407_s29 + $0x50] sm:$0xff] }
 0x2f1   : > { %v475_v55 = vsel %vm1497_vm11, %v465_v54, %v454_v43  ;;  %v1074_v43 = vld [vmem:[%s1407_s29 + $0x48] sm:$0xff]  ;;  %1165 = vmatprep.subr.mxu1 %v296_v41  ;;  %v1076_v54 = vld [vmem:[%s1407_s29 + $0x58] sm:$0xff] }
 0x2f2   : > { %v498_v56 = vadd.f32 %v475_v55, %v394_v16  ;;  %v1234_v44 = vpack.c.bf16 %v1074_v43, %v1073_v42  ;;  %v834_v42 = vstv %s833_s27 }
 0x2f4   : > { %v500_v58 = vmul.f32 0.17677669, %v498_v56  ;;  %1166 = vmatpush3.msra.mxu1 %v296_v41 }
 0x2f5   : > { %1236 = vmatprep.subr.msk.bf16.mxu1 %vm1411_vm1, %v1234_v44 }
 0x2f6   : > { %v502_v59 = vsel %vm1504_vm14, %v500_v58, -1e+30  ;;  %v1240_v58 = vpack.c.bf16 %v1076_v54, %v1075_v53 }
 0x2f7   : > { %v505_v60 = vsel %vm504_vm15, %v502_v59, -inf }
 0x2f8   : > { %506 = vmax.xlane.f32.xlu1 %v505_v60  ;;  %v1077_v60 = vld [vmem:[%s1407_s29 + $0x60] sm:$0xff] }
 0x360   : > { %v482_v62 = vpop.permute.xlu0 %481 }
 0x361   : > { %v487_v63 = vsel %vm485_vm9, 0.0, %v482_v62  ;;  %v1246_v62 = vpack.c.bf16 %v1078_v61, %v1077_v60 }
 0x362   : > { %v499_v1 = vadd.f32 %v1448_v15, %v487_v63  ;;  %v1079_v63 = vld [vmem:[%s1407_s29 + $0x70] sm:$0xff] }
 0x364   : > { %v501_v3 = vmul.f32 0.17677669, %v499_v1  ;;  %v1080_v1 = vld [vmem:[%s1407_s29 + $0x78] sm:$0xff] }
 0x366   : > { %v503_v4 = vsel %vm1513_vm12, %v501_v3, -1e+30  ;;  %v1252_v3 = vpack.c.bf16 %v1080_v1, %v1079_v63  ;;  %v1082_v63 = vld [vmem:[%s1531_s21 + $0x30] sm:$0xff]  ;;  %v1083_v1 = vld [vmem:[%s1531_s21 + $0x38] sm:$0xff] }
 0x367   : > { %v508_v5 = vsel %vm504_vm15, %v503_v4, -inf }
 0x368   : > { %509 = vmax.xlane.f32.xlu0 %v508_v5 }
 0x385   : > { %v507_v7 = vpop.xlane.xlu1 %506 }
 0x386   : > { %v511_v8 = vsub.f32 %v502_v59, %v507_v7  ;;  %v1071_v59 = vld [vmem:[%s1418_s6 + $0x10] sm:$0xff] }
 0x388   : > { %v513_v11 = vmul.f32 1.442695, %v511_v8 }
 0x38a   : > { %1292 = vpow2.f32 %v513_v11 }
 0x394   : > { %v1293_v15 = vpop.eup %1292 }
 0x395   : > { %v517_v16 = vsel %vm1504_vm14, %v1293_v15, 0.0 }
 0x396   : > { %v533_v17 = vmul.f32 %v531_v14, %v517_v16 }
 0x398   : > { %v535_v18 = vsel %vm504_vm15, %v533_v17, 0.0 }
 0x399   : > { %536 = vadd.xlane.f32.xlu0 %v535_v18 }
 0x3f5   : > { %v510_v23 = vpop.xlane.xlu0 %509 }
 0x3f6   : > { %v512_v24 = vsub.f32 %v503_v4, %v510_v23  ;;  %v1072_v4 = vld [vmem:[%s1418_s6 + $0x18] sm:$0xff] }
 0x3f8   : > { %v515_v27 = vmul.f32 1.442695, %v512_v24 }
 0x3fa   : > { %1294 = vpow2.f32 %v515_v27 }
 0x404   : > { %v1295_v32 = vpop.eup %1294 }
 0x405   : > { %v518_v33 = vsel %vm1513_vm12, %v1295_v32, 0.0 }
 0x406   : > { %v534_v34 = vmul.f32 %v532_v31, %v518_v33 }
 0x408   : > { %v538_v36 = vsel %vm504_vm15, %v534_v34, 0.0 }
 0x409   : > { %539 = vadd.xlane.f32.xlu1 %v538_v36 }
 0x426   : > { %v537_v45 = vpop.xlane.xlu0 %536 }
 0x427   : > { %v541_v47 = vadd.f32 1e-08, %v537_v45 }
 0x429   : > { %1296 = vrcp.f32 %v541_v47 }
 0x433   : > { %v1297_v48 = vpop.eup %1296 }
 0x434   : > { %v545_v49 = vmul.f32 %v1297_v48, %v533_v17 }
 0x436   : > { %1167 = vmatprep.mubr.msk.f32.mxu1 %vm504_vm15, %v545_v49 }
 0x496   : > { %v540_v50 = vpop.xlane.xlu1 %539 }
 0x497   : > { %v542_v51 = vadd.f32 1e-08, %v540_v50 }
 0x499   : > { %1298 = vrcp.f32 %v542_v51 }
 0x4a3   : > { %v1299_v55 = vpop.eup %1298 }
 0x4a4   : > { %v546_v56 = vmul.f32 %v1299_v55, %v534_v34 }
 0x4a6   : > { %1168 = vmatmul.mubr.msk.f32.vlgmr.msra.gmra.mrb[0].mxu1 %vm504_vm15, %v546_v56 }
 0x4a7   : > { %1239 = vmatpush3.bf16.xpose.msk.msra.mxu1 %vm1411_vm1, %v1234_v44  ;;  %1186 = vmatprep.mubr.msk.f32.mxu1 %vm297_vm0, %v1071_v59  ;;  %v835_v44 = vadd.f32 %v834_v42, %v1521_v9  ;;  %v836_v9 = vadd.f32 %v834_v42, %v1535_v26  ;;  %v1085_v26 = vld [vmem:[%s1531_s21 + $0x48] sm:$0xff] }
 0x4a8   : > { %1242 = vmatprep.subr.msk.bf16.mxu1 %vm1411_vm1, %v1240_v58 }
 0x4a9   : > { %v837_v45 = vmax.f32 %v835_v44, 0.0  ;;  %v838_v56 = vmax.f32 %v836_v9, 0.0 }
 0x4ab   : > { %v839_v47 = vmin.f32 %v837_v45, 1.0 }
 0x4af   : > { %1245 = vmatpush3.bf16.xpose.msk.msra.mxu1 %vm1411_vm1, %v1240_v58  ;;  %v840_v58 = vmin.f32 %v838_v56, 1.0 }
 0x4b0   : > { %1248 = vmatprep.subr.msk.bf16.mxu1 %vm1411_vm1, %v1246_v62 }
 0x4b7   : > { %1251 = vmatpush3.bf16.xpose.msk.msra.mxu1 %vm1411_vm1, %v1246_v62  ;;  %v1081_v62 = vld [vmem:[%s1531_s21 + $0x28] sm:$0xff] }
 0x4b8   : > { %1254 = vmatprep.subr.msk.bf16.mxu1 %vm1411_vm1, %v1252_v3 }
 0x4bf   : > { %1257 = vmatpush3.bf16.xpose.msk.msra.mxu1 %vm1411_vm1, %v1252_v3  ;;  %vm1669_vm1 = vcmask 7168   ;;  %v1258_v3 = vpack.c.bf16 %v1082_v63, %v1081_v62 }
 0x4c0   : > { %vm1670_vm3 = vmmov %vm1669_vm1 }
 0x4c1   : > { %1259 = vmatprep.subr.bf16.mxu0 %v1258_v3 }
 0x4c2   : > { %1261 = vmatpush3.bf16.msra.mxu0 %v1258_v3 }
 0x4c6   : > { %1187 = vmatmul.mubr.msk.f32.vlgmr.msra.gmra.mrb[2].mxu1 %vm297_vm0, %v1072_v4  ;;  %v1084_v4 = vld [vmem:[%s1531_s21 + $0x40] sm:$0xff] }
 0x579   : > { %v1574_v5 = vpop.f32.mrb[0].mxu1 }
 0x57a   : > { %v1576_v6 = vpop.f32.mrb[1].mxu1 }
 0x599   : > { %v1188_v7 = vpop.f32.mrb[2].mxu1 }
 0x59a   : > { %755 = vrot.lane.b32.xlu0 %v1188_v7, %s1336_s7  ;;  %v742_v8 = vpop.f32.mrb[3].mxu1 }
 0x59b   : > { %753 = vrot.lane.b32.xlu1 %v742_v8, %s1336_s7 }
 0x60c   : > { %v756_v10 = vpop.permute.xlu0 %755 }
 0x60d   : > { %v760_v11 = vsel %vm411_vm2, %v756_v10, 0.0  ;;  %v754_v12 = vpop.permute.xlu1 %753 }
 0x60e   : > { %v759_v0 = vsel %vm411_vm2, %v754_v12, 0.0  ;;  %765 = vrot.lane.b32.xlu1 %v760_v11, %s1337_s8  ;;  %vm1671_vm2 = vcmask 15360  }
 0x60f   : > { %763 = vrot.lane.b32.xlu0 %v759_v0, %s1337_s8  ;;  %vm1672_vm6 = vmmov %vm1671_vm2 }
 0x680   : > { %v766_v13 = vpop.permute.xlu1 %765 }
 0x681   : > { %v770_v14 = vsel %vm1669_vm1, 0.0, %v766_v13  ;;  %v764_v15 = vpop.permute.xlu0 %763 }
 0x682   : > { %v769_v16 = vsel %vm1670_vm3, 0.0, %v764_v15  ;;  %v772_v17 = vsel %vm1457_vm4, %v770_v14, %v760_v11  ;;  %vm1673_vm4 = vcmask 31744  }
 0x683   : > { %777 = vrot.lane.b32.xlu1 %v772_v17, %s1338_s9  ;;  %v771_v18 = vsel %vm1465_vm5, %v769_v16, %v759_v0  ;;  %vm1674_vm5 = vmmov %vm1673_vm4 }
 0x684   : > { %775 = vrot.lane.b32.xlu0 %v771_v18, %s1338_s9 }
 0x6f5   : > { %v778_v19 = vpop.permute.xlu1 %777 }
 0x6f6   : > { %v782_v20 = vsel %vm1671_vm2, 0.0, %v778_v19  ;;  %v776_v21 = vpop.permute.xlu0 %775 }
 0x6f7   : > { %v781_v22 = vsel %vm1672_vm6, 0.0, %v776_v21  ;;  %v784_v23 = vsel %vm1473_vm7, %v782_v20, %v772_v17  ;;  %vm946_vm7 = vcmask 523264  }
 0x6f8   : > { %789 = vrot.lane.b32.xlu1 %v784_v23, %s1339_s10  ;;  %v783_v25 = vsel %vm1481_vm8, %v781_v22, %v771_v18 }
 0x6f9   : > { %787 = vrot.lane.b32.xlu0 %v783_v25, %s1339_s10 }
 0x76a   : > { %v790_v30 = vpop.permute.xlu1 %789 }
 0x76b   : > { %v794_v24 = vsel %vm1673_vm4, 0.0, %v790_v30  ;;  %v788_v27 = vpop.permute.xlu0 %787 }
 0x76c   : > { %v793_v28 = vsel %vm1674_vm5, 0.0, %v788_v27  ;;  %v796_v29 = vsel %vm1489_vm10, %v794_v24, %v784_v23 }
 0x76d   : > { %v795_v35 = vsel %vm1497_vm11, %v793_v28, %v783_v25  ;;  %801 = vrot.lane.b32.xlu1 %v796_v29, %s1340_s11 }
 0x76e   : > { %v809_v31 = vadd.f32 %v795_v35, %v742_v8 }
 0x770   : > { %v811_v40 = vmul.f32 0.17677669, %v809_v31 }
 0x772   : > { %v813_v32 = vsel %vm1504_vm14, %v811_v40, -1e+30 }
 0x773   : > { %v815_v33 = vsel %vm504_vm15, %v813_v32, -inf }
 0x774   : > { %816 = vmax.xlane.f32.xlu0 %v815_v33 }
 0x7df   : > { %v802_v34 = vpop.permute.xlu1 %801 }
 0x7e0   : > { %v806_v36 = vsel %vm485_vm9, 0.0, %v802_v34 }
 0x7e1   : > { %v810_v37 = vadd.f32 %v1188_v7, %v806_v36  ;;  %v1262_v7 = vpack.c.bf16 %v1084_v4, %v1083_v1 }
 0x7e3   : > { %v812_v46 = vmul.f32 0.17677669, %v810_v37  ;;  %1263 = vmatprep.subr.bf16.mxu0 %v1262_v7 }
 0x7e4   : > { %1265 = vmatpush3.bf16.msra.mxu0 %v1262_v7 }
 0x7e5   : > { %v814_v38 = vsel %vm1513_vm12, %v812_v46, -1e+30  ;;  %1197 = vmatprep.subr.mxu0 %v1085_v26 }
 0x7e6   : > { %v818_v52 = vsel %vm504_vm15, %v814_v38, -inf }
 0x7e7   : > { %819 = vmax.xlane.f32.xlu1 %v818_v52 }
 0x7e8   : > { %1198 = vmatpush3.msra.mxu0 %v1085_v26 }
 0x801   : > { %v817_v39 = vpop.xlane.xlu0 %816 }
 0x802   : > { %v821_v41 = vsub.f32 %v813_v32, %v817_v39 }
 0x804   : > { %v823_v43 = vmul.f32 1.442695, %v821_v41 }
 0x806   : > { %1300 = vpow2.f32 %v823_v43 }
 0x810   : > { %v1301_v48 = vpop.eup %1300 }
 0x811   : > { %v827_v49 = vsel %vm1504_vm14, %v1301_v48, 0.0 }
 0x812   : > { %v841_v50 = vmul.f32 %v839_v47, %v827_v49 }
 0x814   : > { %v843_v51 = vsel %vm504_vm15, %v841_v50, 0.0 }
 0x815   : > { %844 = vadd.xlane.f32.xlu0 %v843_v51 }
 0x874   : > { %v820_v53 = vpop.xlane.xlu1 %819 }
 0x875   : > { %v822_v54 = vsub.f32 %v814_v38, %v820_v53 }
 0x877   : > { %v825_v55 = vmul.f32 1.442695, %v822_v54 }
 0x879   : > { %1302 = vpow2.f32 %v825_v55 }
 0x883   : > { %v1303_v59 = vpop.eup %1302 }
 0x884   : > { %v828_v57 = vsel %vm1513_vm12, %v1303_v59, 0.0 }
 0x885   : > { %v842_v60 = vmul.f32 %v840_v58, %v828_v57 }
 0x887   : > { %v846_v61 = vsel %vm504_vm15, %v842_v60, 0.0 }
 0x888   : > { %847 = vadd.xlane.f32.xlu0 %v846_v61 }
 0x8a2   : > { %v845_v8 = vpop.xlane.xlu0 %844 }
 0x8a3   : > { %v849_v10 = vadd.f32 1e-08, %v845_v8 }
 0x8a5   : > { %1304 = vrcp.f32 %v849_v10 }
 0x8af   : > { %v1305_v2 = vpop.eup %1304 }
 0x8b0   : > { %v853_v11 = vmul.f32 %v1305_v2, %v841_v50 }
 0x8b2   : > { %1199 = vmatprep.mubr.msk.f32.mxu0 %vm504_vm15, %v853_v11 }
 0x915   : > { %v848_v12 = vpop.xlane.xlu0 %847 }
 0x916   : > { %v850_v0 = vadd.f32 1e-08, %v848_v12 }
 0x918   : > { %1306 = vrcp.f32 %v850_v0 }
 0x922   : > { %v1307_v13 = vpop.eup %1306 }
 0x923   : > { %v854_v14 = vmul.f32 %v1307_v13, %v842_v60 }
 0x925   : > { %1200 = vmatmul.mubr.msk.f32.vlgmr.msra.gmra.mrb[2].mxu0 %vm504_vm15, %v854_v14 }
 0x9f8   : > { %v1201_v15 = vpop.f32.mrb[2].mxu0 }
 0x9f9   : > { %940 = vrot.lane.b32.xlu0 %v1201_v15, %s1341_s23  ;;  %v927_v16 = vpop.f32.mrb[3].mxu0 }
 0x9fa   : > { %938 = vrot.lane.b32.xlu1 %v927_v16, %s1341_s23 }
 0xa6b   : > { %v941_v17 = vpop.permute.xlu0 %940 }
 0xa6c   : > { %v945_v18 = vsel %vm297_vm0, %v1574_v5, %v941_v17  ;;  %v939_v19 = vpop.permute.xlu1 %938 }
 0xa6d   : > { %948 = vst.msk [vmem:[%s266_s5 + $0x8] sm:$0xff] %vm946_vm7, %v945_v18  ;;  %v944_v20 = vsel %vm297_vm0, %v1576_v6, %v939_v19 }
 0xa6e   : > { %947 = vst.msk [vmem:[%s266_s5] sm:$0xff] %vm946_vm7, %v944_v20 }
 0xa6f PF: > { %s15_s15 = sadd.s32 1, %s1333_s15  }
 0xa70   : > { %p12_p2 = scmp.ge.s32.totalorder %s15_s15, 4  }
 0xa72   :  { %14 = sbr.rel (!%p12_p2) target bundleno = 1 (0x1), region = 80 }
 0xa79   :  { %970 = vsyncpa [#allocation3], 1 }
 0xa7a   :  { %972 = vsyncpa [#allocation3 + $0x1], 1 }

</bundles_post_ra>
